<compile_context>
chip_gen: v7x
topology: tpu7x:2x2x1
jax: 0.10.0
libtpu: 0.0.40
codegen_flags: <defaults>
</compile_context>

<pallas_src>
import jax
import jax.numpy as jnp
from jax.experimental import pallas as pl
from jax.experimental.pallas import tpu as pltpu


def _xor_kernel(x_ref, w1_ref, b1_ref, w2_ref, b2_ref, o_ref):
    # Lane-dense layout (batch on lanes):
    #   x_ref : [D_in, TB]   original dtype, cast to f32 in-kernel
    #   w1_ref: [H, D_in]    (PyTorch lin1.weight layout)
    #   b1_ref: [H, 1]
    #   w2_ref: [H, D_out]   (lin2.weight transposed)
    #   b2_ref: [D_out, 1]
    #   o_ref : [D_out, TB]
    x = x_ref[...].astype(jnp.float32)          # in-kernel cast (VPU, free slot)
    w1 = w1_ref[...]
    b1 = b1_ref[...]
    d_in = x_ref.shape[0]
    d_out = o_ref.shape[0]

    # Layer 1: unrolled VPU outer-product FMAs (K=D_in is tiny -> MXU wasted).
    h = b1 + w1[:, 0:1] * x[0:1, :]
    for k in range(1, d_in):
        h = h + w1[:, k:k + 1] * x[k:k + 1, :]
    h = jnp.tanh(h)                             # [H, TB] on the EUP

    # Layer 2: broadcast-multiply + sublane reduce per output row (XLU).
    w2 = w2_ref[...]                            # [H, D_out]
    b2 = b2_ref[...]                            # [D_out, 1]
    rows = []
    for m in range(d_out):
        rows.append(
            jnp.sum(w2[:, m:m + 1] * h, axis=0, keepdims=True) + b2[m:m + 1, :]
        )
    y = rows[0] if d_out == 1 else jnp.concatenate(rows, axis=0)
    o_ref[...] = jax.nn.sigmoid(y)              # [D_out, TB], lane-dense store


def xor_forward(features, w1, b1, w2, b2, *, tb=8192):
    """features: [B, D_in] (any dtype; cast to f32 inside the kernel).

    w1: [8, D_in], b1: [8]       (PyTorch nn.Linear layout: [out, in])
    w2: [D_out, 8], b2: [D_out]
    returns: [B, D_out] float32
    """
    b, d_in = features.shape
    h_dim = w1.shape[0]
    d_out = w2.shape[0]

    # Lane-dense layout: batch goes on lanes -> [D_in, B]; keep original dtype.
    x_t = jnp.transpose(features)

    # Pad batch to a multiple of the lane tile (kernel columns are independent,
    # zero-padded columns are sliced away afterwards).
    b_align = ((b + 127) // 128) * 128
    tb = min(tb, b_align)
    b_pad = ((b + tb - 1) // tb) * tb
    if b_pad != b:
        x_t = jnp.pad(x_t, ((0, 0), (0, b_pad - b)))

    # Tiny parameter tiles (cast in wrapper; ~200 bytes total).
    w1_f = w1.astype(jnp.float32)                       # [H, D_in]
    b1_c = b1.reshape(h_dim, 1).astype(jnp.float32)     # [H, 1]
    w2_t = jnp.transpose(w2).astype(jnp.float32)        # [H, D_out]
    b2_c = b2.reshape(d_out, 1).astype(jnp.float32)     # [D_out, 1]

    n_tiles = b_pad // tb
    pinned = lambda shape: pl.BlockSpec(shape, lambda i: (0, 0))

    out_t = pl.pallas_call(
        _xor_kernel,
        out_shape=jax.ShapeDtypeStruct((d_out, b_pad), jnp.float32),
        grid_spec=pltpu.PrefetchScalarGridSpec(
            num_scalar_prefetch=0,
            grid=(n_tiles,),
            in_specs=[
                pl.BlockSpec((d_in, tb), lambda i: (0, i)),   # streamed x tiles
                pinned((h_dim, d_in)),                        # resident params
                pinned((h_dim, 1)),
                pinned((h_dim, d_out)),
                pinned((d_out, 1)),
            ],
            out_specs=pl.BlockSpec((d_out, tb), lambda i: (0, i)),
        ),
        compiler_params=pltpu.CompilerParams(
            dimension_semantics=("parallel",),
        ),
    )(x_t, w1_f, b1_c, w2_t, b2_c)

    # Slice off batch padding, transpose back to [B, D_out].
    return jnp.transpose(out_t[:, :b])


def _init_linear(key, out_dim, in_dim):
    # Deterministic init mimicking PyTorch nn.Linear: U(-1/sqrt(fan_in), +...)
    k_w, k_b = jax.random.split(key)
    bound = 1.0 / jnp.sqrt(jnp.float32(in_dim))
    w = jax.random.uniform(k_w, (out_dim, in_dim), jnp.float32, -bound, bound)
    b = jax.random.uniform(k_b, (out_dim,), jnp.float32, -bound, bound)
    return w, b


if __name__ == "__main__":
    key = jax.random.PRNGKey(0)
    k_x, k_l1, k_l2 = jax.random.split(key, 3)

    # XOR-style problem: input_dim=2, hidden=8 (fixed by the module), output_dim=1
    batch, input_dim, output_dim = 8, 2, 1

    # Integer XOR-style features; cast happens inside the kernel (features.float()).
    features = jax.random.randint(k_x, (batch, input_dim), 0, 2).astype(jnp.int32)

    w1, b1 = _init_linear(k_l1, 8, input_dim)
    w2, b2 = _init_linear(k_l2, output_dim, 8)

    out = xor_forward(features, w1, b1, w2, b2)
    out = jax.block_until_ready(out)

    # Reference check in plain JAX.
    xf = features.astype(jnp.float32)
    ref = jax.nn.sigmoid(jnp.tanh(xf @ w1.T + b1) @ w2.T + b2)
    assert out.shape == (batch, output_dim)
    assert jnp.allclose(out, ref, atol=1e-5), "mismatch vs reference"

    print("KERNEL_OK")
</pallas_src>

<mosaic_0001>
module attributes {stable_mosaic.version = 11 : i64} {
  func.func @_xor_kernel(%arg0: i32, %arg1: memref<2x128xi32, #tpu.memory_space<vmem>>, %arg2: memref<8x2xf32, #tpu.memory_space<vmem>>, %arg3: memref<8x1xf32, #tpu.memory_space<vmem>>, %arg4: memref<8x1xf32, #tpu.memory_space<vmem>>, %arg5: memref<1x1xf32, #tpu.memory_space<vmem>>, %arg6: memref<1x128xf32, #tpu.memory_space<vmem>>) attributes {dimension_semantics = [#tpu.dimension_semantics<parallel>], iteration_bounds = array<i64: 1>, scalar_prefetch = 0 : i64, scratch_operands = 0 : i64, tpu.core_type = #tpu.core_type<tc>, window_params = [{transform_indices = @transform_0, window_bounds = array<i64: 2, 128>}, {pipeline_mode = #tpu.pipeline_mode<synchronous>, transform_indices = @transform_1, window_bounds = array<i64: 8, 2>}, {pipeline_mode = #tpu.pipeline_mode<synchronous>, transform_indices = @transform_2, window_bounds = array<i64: 8, 1>}, {pipeline_mode = #tpu.pipeline_mode<synchronous>, transform_indices = @transform_3, window_bounds = array<i64: 8, 1>}, {pipeline_mode = #tpu.pipeline_mode<synchronous>, transform_indices = @transform_4, window_bounds = array<i64: 1, 1>}, {transform_indices = @transform_5, window_bounds = array<i64: 1, 128>}]} {
    %c0 = arith.constant 0 : index
    %c0_0 = arith.constant 0 : index
    %0 = vector.load %arg1[%c0, %c0_0] : memref<2x128xi32, #tpu.memory_space<vmem>>, vector<2x128xi32>
    %1 = arith.sitofp %0 : vector<2x128xi32> to vector<2x128xf32>
    %c0_1 = arith.constant 0 : index
    %c0_2 = arith.constant 0 : index
    %2 = vector.load %arg2[%c0_1, %c0_2] : memref<8x2xf32, #tpu.memory_space<vmem>>, vector<8x2xf32>
    %c0_3 = arith.constant 0 : index
    %c0_4 = arith.constant 0 : index
    %3 = vector.load %arg3[%c0_3, %c0_4] : memref<8x1xf32, #tpu.memory_space<vmem>>, vector<8x1xf32>
    %4 = vector.extract_strided_slice %2 {offsets = [0, 0], sizes = [8, 1], strides = [1, 1]} : vector<8x2xf32> to vector<8x1xf32>
    %5 = vector.extract_strided_slice %1 {offsets = [0, 0], sizes = [1, 128], strides = [1, 1]} : vector<2x128xf32> to vector<1x128xf32>
    %6 = vector.broadcast %4 : vector<8x1xf32> to vector<8x128xf32>
    %7 = vector.broadcast %5 : vector<1x128xf32> to vector<8x128xf32>
    %8 = arith.mulf %6, %7 : vector<8x128xf32>
    %9 = vector.broadcast %3 : vector<8x1xf32> to vector<8x128xf32>
    %10 = arith.addf %9, %8 : vector<8x128xf32>
    %11 = vector.extract_strided_slice %2 {offsets = [0, 1], sizes = [8, 1], strides = [1, 1]} : vector<8x2xf32> to vector<8x1xf32>
    %12 = vector.extract_strided_slice %1 {offsets = [1, 0], sizes = [1, 128], strides = [1, 1]} : vector<2x128xf32> to vector<1x128xf32>
    %13 = vector.broadcast %11 : vector<8x1xf32> to vector<8x128xf32>
    %14 = vector.broadcast %12 : vector<1x128xf32> to vector<8x128xf32>
    %15 = arith.mulf %13, %14 : vector<8x128xf32>
    %16 = arith.addf %10, %15 : vector<8x128xf32>
    %17 = math.tanh %16 : vector<8x128xf32>
    %c0_5 = arith.constant 0 : index
    %c0_6 = arith.constant 0 : index
    %18 = vector.load %arg4[%c0_5, %c0_6] : memref<8x1xf32, #tpu.memory_space<vmem>>, vector<8x1xf32>
    %c0_7 = arith.constant 0 : index
    %c0_8 = arith.constant 0 : index
    %19 = vector.load %arg5[%c0_7, %c0_8] : memref<1x1xf32, #tpu.memory_space<vmem>>, vector<1x1xf32>
    %20 = vector.broadcast %18 : vector<8x1xf32> to vector<8x128xf32>
    %21 = arith.mulf %20, %17 : vector<8x128xf32>
    %cst = arith.constant dense<0.000000e+00> : vector<128xf32>
    %22 = vector.multi_reduction <add>, %21, %cst [0] : vector<8x128xf32> to vector<128xf32>
    %23 = vector.shape_cast %22 : vector<128xf32> to vector<1x128xf32>
    %24 = vector.broadcast %19 : vector<1x1xf32> to vector<1x128xf32>
    %25 = arith.addf %23, %24 : vector<1x128xf32>
    %26 = arith.negf %25 : vector<1x128xf32>
    %27 = math.exp %26 : vector<1x128xf32>
    %cst_9 = arith.constant 1.000000e+00 : f32
    %28 = vector.broadcast %cst_9 : f32 to vector<1x128xf32>
    %29 = arith.addf %28, %27 : vector<1x128xf32>
    %30 = arith.divf %28, %29 : vector<1x128xf32>
    %c0_10 = arith.constant 0 : index
    %c0_11 = arith.constant 0 : index
    %31 = vector.load %arg6[%c0_10, %c0_11] : memref<1x128xf32, #tpu.memory_space<vmem>>, vector<1x128xf32>
    tpu.vector_store %arg6[%c0_10, %c0_11], %30 {strides = array<i32>} : memref<1x128xf32, #tpu.memory_space<vmem>>, vector<1x128xf32>,
    return
  }
  func.func @transform_0(%arg0: i32) -> (i32, i32) {
    %c0_i32 = arith.constant 0 : i32
    %c0_i32_0 = arith.constant 0 : i32
    return %c0_i32, %arg0 : i32, i32
  }
  func.func @transform_1(%arg0: i32) -> (i32, i32) {
    %c0_i32 = arith.constant 0 : i32
    %c0_i32_0 = arith.constant 0 : i32
    %c0_i32_1 = arith.constant 0 : i32
    return %c0_i32, %c0_i32_0 : i32, i32
  }
  func.func @transform_2(%arg0: i32) -> (i32, i32) {
    %c0_i32 = arith.constant 0 : i32
    %c0_i32_0 = arith.constant 0 : i32
    %c0_i32_1 = arith.constant 0 : i32
    return %c0_i32, %c0_i32_0 : i32, i32
  }
  func.func @transform_3(%arg0: i32) -> (i32, i32) {
    %c0_i32 = arith.constant 0 : i32
    %c0_i32_0 = arith.constant 0 : i32
    %c0_i32_1 = arith.constant 0 : i32
    return %c0_i32, %c0_i32_0 : i32, i32
  }
  func.func @transform_4(%arg0: i32) -> (i32, i32) {
    %c0_i32 = arith.constant 0 : i32
    %c0_i32_0 = arith.constant 0 : i32
    %c0_i32_1 = arith.constant 0 : i32
    return %c0_i32, %c0_i32_0 : i32, i32
  }
  func.func @transform_5(%arg0: i32) -> (i32, i32) {
    %c0_i32 = arith.constant 0 : i32
    %c0_i32_0 = arith.constant 0 : i32
    return %c0_i32, %arg0 : i32, i32
  }
}

</mosaic_0001>

<bundles_post_ra>
// kernel: tpu_custom_call.1
= control target key start
LH: loop header
LB: loop body
LE: loop exit
PB: predicated region body
PF: predicated region fallthrough
CT: control target
= control target key end

     0   :  { %s196_s0 = inlined_call_operand.vmem [shape: s32[2,128], index: 0, kind: input, shape index: {}]   ;;  %s197_s1 = inlined_call_operand.vmem [shape: f32[8,2], index: 1, kind: input, shape index: {}]   ;;  %s198_s2 = inlined_call_operand.vmem [shape: f32[8,1], index: 2, kind: input, shape index: {}]   ;;  %s199_s3 = inlined_call_operand.vmem [shape: f32[8,1], index: 3, kind: input, shape index: {}]   ;;  %s200_s4 = inlined_call_operand.<no memory space> [shape: f32[1,1], index: 4, kind: input, shape index: {}]   ;;  %s201_s5 = inlined_call_operand.hbm [shape: f32[1,128], index: 5, kind: output, shape index: {}]  }
   0x1   :  { %v10_v0 = vstv %s200_s4 }
   0x2   :  { %11 = vst [vmem:[#allocation2] sm:$0x1] %v10_v0 }
   0x3   :  { %v25_v1 = vld [vmem:[%s197_s1] sm:$0xff]  ;;  %v136_v2 = vmov 0   ;;  %v137_v3 = vmov 1  }
   0x4   :  { %103 = vset.pattern.permute.xlu0 %v136_v2  ;;  %104 = vset.pattern.permute.xlu1 %v137_v3 }
   0x5   :  { %12 = vsyncpa [#allocation4], 0  ;;  %29 = vperm.xlu0 %103, %v25_v1   ;;  %44 = vperm.xlu1 %104, %v25_v1   ;;  %v26_v4 = vld [vmem:[%s198_s2] sm:$0xff]  ;;  %v32_v7 = vlaneseq }
   0x6   :  { %v54_v5 = vld [vmem:[%s199_s3] sm:$0xff] }
   0x7   :  { %v33_v8 = vshrl.u32 %v32_v7, 7  ;;  %v23_v9 = vld [vmem:[%s196_s0] sm:$0x3]  ;;  %s138_s0 = smov [#allocation3]  }
   0x8   :  { %v24_v11 = vcvt.s32.f32 %v23_v9  ;;  %s91_s2 = sshll.u32 %s138_s0, 4  ;;  %s92_s2 = int_to_ptr.vmem [resolvable:$true] %s91_s2 }
   0x9   :  { %39 = vperm.xlu0 %103, %v26_v4   ;;  %105 = vset.pattern.permute.xlu1 %v136_v2  ;;  %v55_v6 = vld [vmem:[#allocation2] sm:$0x1]  ;;  %v34_v10 = vsub.s32 0, %v33_v8  ;;  %v49_v12 = vsub.s32 1, %v33_v8  ;;  %s112_s3 = scalar_lea.vmem %s92_s2, 16  ;;  %s116_s26 = scalar_lea.vmem %s92_s2, 32 }
   0xa   :  { %58 = vperm.xlu1 %105, %v54_v5   ;;  %p113_p0 = scmp.ne.s32.totalorder %s92_s2, %s112_s3  ;;  %p117_p1 = scmp.lt.s32.totalorder %s92_s2, %s92_s2 }
   0xb   :  { %v35_v13 = vrot.slane %v24_v11, %v34_v10  ;;  %v50_v14 = vrot.slane %v24_v11, %v49_v12  ;;  %p118_p2 = scmp.lt.s32.totalorder %s116_s26, %s112_s3 }
   0xd   :  { %70 = vperm.xlu0 %103, %v55_v6   ;;  %p119_p3 = por %p118_p2, %p117_p1 }
   0xf   :  { %p120_p4 = pnand %p119_p3, %p113_p0 }
  0x84   :  { %v30_v15 = vpop.permute.xlu0 %29  ;;  %v45_v16 = vpop.permute.xlu1 %44 }
  0x85   :  { %v36_v17 = vmul.f32 %v35_v13, %v30_v15  ;;  %v51_v18 = vmul.f32 %v50_v14, %v45_v16 }
  0x88   :  { %v40_v19 = vpop.permute.xlu0 %39 }
  0x89   :  { %v42_v20 = vadd.f32 %v40_v19, %v36_v17  ;;  %v59_v22 = vpop.permute.xlu1 %58 }
  0x8b   :  { %v52_v21 = vadd.f32 %v51_v18, %v42_v20 }
  0x8c   :  { %v71_v29 = vpop.permute.xlu0 %70 }
  0x8d   :  { %106 = vtanh.f32 %v52_v21  ;;  %v76_v31 = vrot.slane %v71_v29, %v34_v10 }
  0x97   :  { %v107_v23 = vpop.eup %106 }
  0x98   :  { %v61_v24 = vmul.f32 %v107_v23, %v59_v22 }
  0x9a   :  { %v62_v25 = vrot.slane %v61_v24, 4 }
  0x9c   :  { %v63_v26 = vadd.f32 %v62_v25, %v61_v24 }
  0x9e   :  { %v64_v27 = vrot.slane %v63_v26, 2 }
  0xa0   :  { %v65_v28 = vadd.f32 %v64_v27, %v63_v26 }
  0xa2   :  { %v66_v30 = vrot.slane %v65_v28, 1 }
  0xa4   :  { %v67_v32 = vadd.f32 %v66_v30, %v65_v28 }
  0xa6   :  { %v77_v33 = vadd.f32 %v76_v31, %v67_v32 }
  0xa8   :  { %v99_v34 = vmul.f32 -1.442695, %v77_v33 }
  0xaa   :  { %108 = vpow2.f32 %v99_v34 }
  0xb4   :  { %v109_v35 = vpop.eup %108 }
  0xb5   :  { %v81_v36 = vadd.f32 1.0, %v109_v35 }
  0xb7   :  { %110 = vrcp.f32 %v81_v36 }
  0xc1   :  { %v111_v37 = vpop.eup %110 }
  0xc2   :  { %84 = vst [vmem:[#allocation3] sm:$0x1] %v111_v37 }
  0xc3   :  { %123 = shalt.err (!%p120_p4)
}
  0xc4   :  { %s124_s29 = scalar_lea.hbm %s201_s5, 16 }
  0xc5   :  { %p125_p5 = scmp.ne.s32.totalorder %s201_s5, %s124_s29  ;;  %p128_p6 = scmp.lt.u32.totalorder %s124_s29, %s201_s5 }
  0xc7   :  { %p130_p7 = pnand %p128_p6, %p125_p5 }
  0xc9   :  { %133 = shalt.err (!%p130_p7)
}
  0xca   :  { %94 = dma.vmem_to_hbm [thread:$0]  %s92_s2, 16, %s201_s5, [#allocation4]  }
  0xcb   :  { %134 = dma.done.wait [#allocation4], 16  }
  0xcc   :  { %135 = vsyncadd [#allocation4], 4294967280 }
  0xcd   :  { %98 = vsyncpa [#allocation4], 1 }

</bundles_post_ra>
